<compile_context>
chip_gen: v7x
topology: tpu7x:2x2x1
jax: 0.10.0
libtpu: 0.0.40
codegen_flags: <defaults>
</compile_context>

<pallas_src>
import jax
import jax.numpy as jnp
import numpy as np
from jax import lax
from jax.experimental import pallas as pl
from jax.experimental.pallas import tpu as pltpu


def _round_up(x, m):
    return ((x + m - 1) // m) * m


def _pick_tiles():
    """Per-generation tile budget (conservative default fits v7x's 64 MiB)."""
    te, ts = 512, 256
    try:
        info = pltpu.get_tpu_info()
        if getattr(info, "vmem_capacity_bytes", 0) >= (96 << 20):
            te, ts = 1024, 512          # v5e / v6e: 128 MiB VMEM
    except Exception:
        pass
    return te, ts


TILE_E, TILE_SEG = _pick_tiles()


# -----------------------------------------------------------------------------
# Kernel: one (segment-tile, edge-tile) step of the staircase schedule.
#   out[seg_tile] = W_self(self) + b_self + recip * sum_e one_hot(seg) * msg(e)
# -----------------------------------------------------------------------------
def _sorted_segment_update_kernel(st_ref, et_ref, ff_ref,          # scalar prefetch
                                  x_ref, eseg_ref, self_ref, recip_ref,
                                  w_msg_ref, w_self_ref, b_self_ref,
                                  out_ref):
    p = pl.program_id(0)

    # First step touching this segment tile: initialize the resident output
    # block with the self transform (f32 matmul; tiny, once per segment tile).
    @pl.when(ff_ref[p] == 1)
    def _init():
        out_ref[...] = (jnp.dot(self_ref[...], w_self_ref[...],
                                preferred_element_type=jnp.float32)
                        + b_self_ref[...])
        # TODO(synk): act is None and nn.Dropout is identity in inference mode.

    # Per-edge message: blended [feat*s0, s0, feat*s1, s1] @ [W_a;b_a;W_b;b_b]
    # (inv-branch select + bias folded into one bf16 MXU matmul, f32 acc).
    msg = jnp.dot(x_ref[...], w_msg_ref[...],
                  preferred_element_type=jnp.float32)               # (TE, Dout)

    # Masked aggregation: transposed one-hot built from a lane-only subtract
    # of the segment-tile base from the (1, TE) segment-id row.
    ts_blk = out_ref.shape[0]
    te_blk = x_ref.shape[0]
    base = st_ref[p] * ts_blk                                        # scalar
    local = eseg_ref[0] - base                                       # (1, TE)
    iota = lax.broadcasted_iota(jnp.int32, (ts_blk, te_blk), 0)      # invariant
    oh = (iota == local).astype(jnp.bfloat16)                        # (TS, TE)
    agg = jnp.dot(oh, msg.astype(jnp.bfloat16),
                  preferred_element_type=jnp.float32)                # (TS, Dout)

    # 1/in-degree applied in f32 (distributes over partial sums, so per-step
    # scaling equals scaling the final sum).
    out_ref[...] += agg * recip_ref[...]


# -----------------------------------------------------------------------------
# Wrapper-side schedule: staircase over (segment-tile, edge-tile) pairs,
# >= 1 step per segment tile, static length num_s + num_e_tiles.
# -----------------------------------------------------------------------------
def _build_schedule(seg_sorted, num_s, ts, te, num_e_tiles):
    bounds = jnp.searchsorted(
        seg_sorted,
        jnp.arange(num_s + 1, dtype=seg_sorted.dtype) * ts, side="left")
    start, end = bounds[:-1], bounds[1:]
    ntiles = jnp.where(end > start,
                       (end - 1) // te - start // te + 1, 0).astype(jnp.int32)
    first_tile = (start // te).astype(jnp.int32)
    steps = jnp.maximum(ntiles, 1)
    csum = jnp.cumsum(steps)
    offs = csum - steps
    total = csum[-1]

    n_steps = num_s + num_e_tiles                   # static upper bound
    pos = jnp.arange(n_steps, dtype=jnp.int32)
    s_of_p = jnp.minimum(jnp.searchsorted(csum, pos, side="right"),
                         num_s - 1).astype(jnp.int32)
    j = pos - offs[s_of_p]
    valid = pos < total
    seg_tile = jnp.where(valid, s_of_p, num_s - 1).astype(jnp.int32)
    edge_tile = jnp.where(valid & (ntiles[s_of_p] > 0),
                          first_tile[s_of_p] + j, num_e_tiles).astype(jnp.int32)
    first = jnp.where(valid, (j == 0).astype(jnp.int32), 0).astype(jnp.int32)
    return seg_tile, edge_tile, first


# -----------------------------------------------------------------------------
# Shared entity / relation update:
#   out[n] = self_emb @ W_self + b_self + mean_{edges: seg==n} msg(edge)
# -----------------------------------------------------------------------------
def _segment_mean_update(feat, inv, seg, self_emb,
                         w_a, b_a, w_b, b_b, w_self, b_self):
    E, d_in_e = feat.shape
    n_seg, d_in_s = self_emb.shape
    d_out = w_a.shape[1]

    te = min(TILE_E, _round_up(E, 8))
    ts = min(TILE_SEG, _round_up(n_seg, 8))
    n_pad = _round_up(n_seg, ts)
    num_s = n_pad // ts
    num_e_tiles = (E + te - 1) // te
    k = 2 * d_in_e + 2
    k_pad = _round_up(k, 128)                       # lane-aligned edge stream
    if d_out % 128 == 0:
        d_out_pad = d_out
    elif d_out > 64:
        d_out_pad = _round_up(d_out, 128)           # lane-dense output slab
    else:
        d_out_pad = _round_up(d_out, 8)             # tiny dim: skip 4-8x zero pad

    # ---- sort edges by destination segment (wrapper glue) -------------------
    seg = seg.astype(jnp.int32)
    order = jnp.argsort(seg)
    seg_s = seg[order]
    feat_s = feat[order]
    inv_s = inv[order].astype(jnp.float32)[:, None]

    # Blended edge inputs [feat*(1-inv), (1-inv), feat*inv, inv]; selectors are
    # exact in bf16, 1/deg is NOT folded here (applied in f32 in-kernel).
    sel0 = 1.0 - inv_s
    x = jnp.concatenate([feat_s * sel0, sel0, feat_s * inv_s, inv_s], axis=-1)
    rows = (num_e_tiles + 1) * te                   # +1 all-sentinel no-op tile
    x = jnp.pad(x, ((0, rows - E), (0, k_pad - k))).astype(jnp.bfloat16)
    eseg = jnp.pad(seg_s, (0, rows - E), constant_values=n_pad)   # never matches
    eseg3 = eseg.reshape(num_e_tiles + 1, 1, te)

    st, et, ff = _build_schedule(seg_s, num_s, ts, te, num_e_tiles)
    num_steps = int(st.shape[0])

    # Per-segment 1/in-degree (f32, applied inside the kernel).
    cnt = jnp.zeros((n_seg,), jnp.float32).at[seg].add(1.0)
    recip = (1.0 / jnp.maximum(cnt, 1.0))[:, None]
    recip = jnp.pad(recip, ((0, n_pad - n_seg), (0, 0)))

    # Stacked message weight [W_a; b_a; W_b; b_b] (branch a == inv==0).
    w_msg = jnp.concatenate([w_a, b_a, w_b, b_b], axis=0)
    w_msg = jnp.pad(w_msg, ((0, k_pad - k), (0, d_out_pad - d_out))).astype(jnp.bfloat16)

    w_self_p = jnp.pad(w_self, ((0, 0), (0, d_out_pad - d_out)))
    b_self_p = jnp.pad(b_self, ((0, 0), (0, d_out_pad - d_out)))
    self_p = jnp.pad(self_emb, ((0, n_pad - n_seg), (0, 0)))

    out = pl.pallas_call(
        _sorted_segment_update_kernel,
        out_shape=jax.ShapeDtypeStruct((n_pad, d_out_pad), jnp.float32),
        grid_spec=pltpu.PrefetchScalarGridSpec(
            num_scalar_prefetch=3,
            grid=(num_steps,),
            in_specs=[
                pl.BlockSpec((te, k_pad), lambda p, st, et, ff: (et[p], 0)),
                pl.BlockSpec((1, 1, te), lambda p, st, et, ff: (et[p], 0, 0)),
                pl.BlockSpec((ts, d_in_s), lambda p, st, et, ff: (st[p], 0)),
                pl.BlockSpec((ts, 1), lambda p, st, et, ff: (st[p], 0)),
                pl.BlockSpec((k_pad, d_out_pad), lambda p, st, et, ff: (0, 0)),
                pl.BlockSpec((d_in_s, d_out_pad), lambda p, st, et, ff: (0, 0)),
                pl.BlockSpec((1, d_out_pad), lambda p, st, et, ff: (0, 0)),
            ],
            out_specs=pl.BlockSpec((ts, d_out_pad),
                                   lambda p, st, et, ff: (st[p], 0)),
        ),
        compiler_params=pltpu.CompilerParams(
            dimension_semantics=("arbitrary",),
            vmem_limit_bytes=32 * 1024 * 1024,
        ),
    )(st, et, ff, x, eseg3, self_p, recip, w_msg, w_self_p, b_self_p)
    return out[:n_seg, :d_out]


@jax.jit
def ext_gnn_forward(params, ent_emb, rel_emb, time_emb, src, dst, b_rel, time_ids, inv):
    time_h = time_emb[time_ids]                                   # (E, Dt)

    # ---- entity update -------------------------------------------------------
    comp_h = jnp.concatenate([rel_emb[b_rel], ent_emb[src], time_h], axis=-1)
    ent_new = _segment_mean_update(
        comp_h, inv, dst, ent_emb,
        params["W_I_w"], params["W_I_b"], params["W_O_w"], params["W_O_b"],
        params["W_S_w"], params["W_S_b"])

    # ---- relation update (uses the UPDATED entity embeddings) ----------------
    edge_h = jnp.concatenate([ent_new[src], ent_new[dst], time_h], axis=-1)
    rel_new = _segment_mean_update(
        edge_h, inv, b_rel, rel_emb,
        params["W_r_ori_w"], params["W_r_ori_b"],
        params["W_r_inv_w"], params["W_r_inv_b"],
        params["W_R_w"], params["W_R_b"])

    return ent_new, rel_new


# -----------------------------------------------------------------------------
# Pure-JAX f32 reference (correctness sanity check)
# -----------------------------------------------------------------------------
def ext_gnn_reference(params, ent_emb, rel_emb, time_emb, src, dst, b_rel, time_ids, inv):
    N = ent_emb.shape[0]
    R = rel_emb.shape[0]
    inv_f = inv.astype(jnp.float32)[:, None]

    comp_h = jnp.concatenate([rel_emb[b_rel], ent_emb[src], time_emb[time_ids]], axis=-1)
    msg_i = comp_h @ params["W_I_w"] + params["W_I_b"]
    msg_o = comp_h @ params["W_O_w"] + params["W_O_b"]
    msg = jnp.where(inv_f == 0.0, msg_i, msg_o)
    agg = jnp.zeros((N, msg.shape[1]), jnp.float32).at[dst].add(msg)
    cnt = jnp.zeros((N,), jnp.float32).at[dst].add(1.0)[:, None]
    h_agg = agg / jnp.maximum(cnt, 1.0)
    ent_new = ent_emb @ params["W_S_w"] + params["W_S_b"] + h_agg

    edge_h = jnp.concatenate([ent_new[src], ent_new[dst], time_emb[time_ids]], axis=-1)
    eh_o = edge_h @ params["W_r_ori_w"] + params["W_r_ori_b"]
    eh_i = edge_h @ params["W_r_inv_w"] + params["W_r_inv_b"]
    eh = jnp.where(inv_f == 0.0, eh_o, eh_i)
    ragg = jnp.zeros((R, eh.shape[1]), jnp.float32).at[b_rel].add(eh)
    rcnt = jnp.zeros((R,), jnp.float32).at[b_rel].add(1.0)[:, None]
    r_agg = ragg / jnp.maximum(rcnt, 1.0)
    rel_new = rel_emb @ params["W_R_w"] + params["W_R_b"] + r_agg
    return ent_new, rel_new


if __name__ == "__main__":
    # ---- small deterministic problem sizes ----
    N_NODES, N_EDGES = 8, 16
    N_RELS, N_TIMES = 4, 5
    ENT_DIM, REL_DIM, TIME_DIM = 32, 16, 8
    D_IN1 = TIME_DIM + REL_DIM + ENT_DIM     # W_I / W_O input
    D_IN2 = TIME_DIM + ENT_DIM + ENT_DIM     # W_r_ori / W_r_inv input

    key = jax.random.PRNGKey(0)
    ks = jax.random.split(key, 20)

    def lin(kw, kb, d_in, d_out):
        # Deterministic synthetic Linear params; stored as (d_in, d_out): y = x @ W + b.
        w = 0.1 * jax.random.normal(kw, (d_in, d_out), dtype=jnp.float32)
        b = 0.05 * jax.random.normal(kb, (1, d_out), dtype=jnp.float32)
        return w, b

    params = {}
    params["W_O_w"], params["W_O_b"] = lin(ks[0], ks[1], D_IN1, ENT_DIM)
    params["W_I_w"], params["W_I_b"] = lin(ks[2], ks[3], D_IN1, ENT_DIM)
    params["W_S_w"], params["W_S_b"] = lin(ks[4], ks[5], ENT_DIM, ENT_DIM)
    params["W_r_ori_w"], params["W_r_ori_b"] = lin(ks[6], ks[7], D_IN2, REL_DIM)
    params["W_r_inv_w"], params["W_r_inv_b"] = lin(ks[8], ks[9], D_IN2, REL_DIM)
    params["W_R_w"], params["W_R_b"] = lin(ks[10], ks[11], REL_DIM, REL_DIM)
    # TODO(synk): nn.Dropout(gcn_drop) is treated as identity (inference mode).

    ent_emb = jax.random.normal(ks[12], (N_NODES, ENT_DIM), dtype=jnp.float32)
    rel_emb = jax.random.normal(ks[13], (N_RELS, REL_DIM), dtype=jnp.float32)
    time_emb = jax.random.normal(ks[14], (N_TIMES, TIME_DIM), dtype=jnp.float32)

    src = jax.random.randint(ks[15], (N_EDGES,), 0, N_NODES, dtype=jnp.int32)
    dst = jax.random.randint(ks[16], (N_EDGES,), 0, N_NODES, dtype=jnp.int32)
    b_rel = jax.random.randint(ks[17], (N_EDGES,), 0, N_RELS, dtype=jnp.int32)
    time_ids = jax.random.randint(ks[18], (N_EDGES,), 0, N_TIMES, dtype=jnp.int32)
    inv = jax.random.randint(ks[19], (N_EDGES,), 0, 2, dtype=jnp.int32)

    ent_new, rel_new = ext_gnn_forward(
        params, ent_emb, rel_emb, time_emb, src, dst, b_rel, time_ids, inv)
    jax.block_until_ready((ent_new, rel_new))

    ent_ref, rel_ref = ext_gnn_reference(
        params, ent_emb, rel_emb, time_emb, src, dst, b_rel, time_ids, inv)
    # Edge matmuls run in bf16 (f32 accumulation); 1/deg and self path stay f32,
    # so the tolerance mainly covers bf16 feature/message rounding.
    np.testing.assert_allclose(np.asarray(ent_new), np.asarray(ent_ref), rtol=3e-2, atol=3e-2)
    np.testing.assert_allclose(np.asarray(rel_new), np.asarray(rel_ref), rtol=3e-2, atol=3e-2)

    print("KERNEL_OK")
</pallas_src>

<mosaic_0001>
module attributes {stable_mosaic.version = 11 : i64} {
  func.func private @main(%arg0: i32) attributes {dimension_semantics = [#tpu.dimension_semantics<core_parallel>], iteration_bounds = array<i64: 2>, tpu.core_type = #tpu.core_type<sc_scalar_subcore>, window_params = []} {
    return
  }
}

module attributes {stable_mosaic.version = 11 : i64} {
  func.func private @main(%arg0: i32) attributes {dimension_semantics = [#tpu.dimension_semantics<core_parallel>], iteration_bounds = array<i64: 2>, tpu.core_type = #tpu.core_type<sc_scalar_subcore>, window_params = []} {
    return
  }
}

module attributes {stable_mosaic.version = 11 : i64} {
  func.func @_sorted_segment_update_kernel(%arg0: i32, %arg1: memref<2xi32, #tpu.memory_space<smem>>, %arg2: memref<2xi32, #tpu.memory_space<smem>>, %arg3: memref<2xi32, #tpu.memory_space<smem>>, %arg4: memref<16x128xbf16, #tpu.memory_space<vmem>>, %arg5: memref<1x1x16xi32, #tpu.memory_space<vmem>>, %arg6: memref<8x32xf32, #tpu.memory_space<vmem>>, %arg7: memref<8x1xf32, #tpu.memory_space<vmem>>, %arg8: memref<128x32xbf16, #tpu.memory_space<vmem>>, %arg9: memref<32x32xf32, #tpu.memory_space<vmem>>, %arg10: memref<1x32xf32, #tpu.memory_space<vmem>>, %arg11: memref<8x32xf32, #tpu.memory_space<vmem>>) attributes {dimension_semantics = [#tpu.dimension_semantics<arbitrary>], iteration_bounds = array<i64: 2>, scalar_prefetch = 3 : i64, scratch_operands = 0 : i64, tpu.core_type = #tpu.core_type<tc>, window_params = [{transform_indices = @transform_0, window_bounds = array<i64: 16, 128>}, {transform_indices = @transform_1, window_bounds = array<i64: 1, 1, 16>}, {transform_indices = @transform_2, window_bounds = array<i64: 8, 32>}, {transform_indices = @transform_3, window_bounds = array<i64: 8, 1>}, {pipeline_mode = #tpu.pipeline_mode<synchronous>, transform_indices = @transform_4, window_bounds = array<i64: 128, 32>}, {pipeline_mode = #tpu.pipeline_mode<synchronous>, transform_indices = @transform_5, window_bounds = array<i64: 32, 32>}, {pipeline_mode = #tpu.pipeline_mode<synchronous>, transform_indices = @transform_6, window_bounds = array<i64: 1, 32>}, {transform_indices = @transform_7, window_bounds = array<i64: 8, 32>}]} {
    %0 = arith.index_cast %arg0 : i32 to index
    %1 = memref.load %arg3[%0] : memref<2xi32, #tpu.memory_space<smem>>
    %c1_i32 = arith.constant 1 : i32
    %2 = arith.cmpi eq, %1, %c1_i32 : i32
    %3 = arith.extui %2 : i1 to i32
    %c0_i32 = arith.constant 0 : i32
    %4 = arith.cmpi ne, %3, %c0_i32 : i32
    scf.if %4 {
      %c0_13 = arith.constant 0 : index
      %c0_14 = arith.constant 0 : index
      %29 = vector.load %arg6[%c0_13, %c0_14] : memref<8x32xf32, #tpu.memory_space<vmem>>, vector<8x32xf32>
      %c0_15 = arith.constant 0 : index
      %c0_16 = arith.constant 0 : index
      %30 = vector.load %arg9[%c0_15, %c0_16] : memref<32x32xf32, #tpu.memory_space<vmem>>, vector<32x32xf32>
      %cst_17 = arith.constant dense<0.000000e+00> : vector<8x32xf32>
      %31 = tpu.matmul %29, %30, %cst_17 {dimension_numbers = #tpu.dot_dimension_numbers<[1], [0], [0], [1], [0, 0, 1, 1], [], []>} : vector<8x32xf32>, vector<32x32xf32>, vector<8x32xf32> -> vector<8x32xf32>
      %c0_18 = arith.constant 0 : index
      %c0_19 = arith.constant 0 : index
      %32 = vector.load %arg10[%c0_18, %c0_19] : memref<1x32xf32, #tpu.memory_space<vmem>>, vector<1x32xf32>
      %33 = vector.broadcast %32 : vector<1x32xf32> to vector<8x32xf32>
      %34 = arith.addf %31, %33 : vector<8x32xf32>
      %c0_20 = arith.constant 0 : index
      %c0_21 = arith.constant 0 : index
      %35 = vector.load %arg11[%c0_20, %c0_21] : memref<8x32xf32, #tpu.memory_space<vmem>>, vector<8x32xf32>
      tpu.vector_store %arg11[%c0_20, %c0_21], %34 {strides = array<i32>} : memref<8x32xf32, #tpu.memory_space<vmem>>, vector<8x32xf32>,
    } else {
    }
    %c0 = arith.constant 0 : index
    %c0_0 = arith.constant 0 : index
    %5 = vector.load %arg4[%c0, %c0_0] : memref<16x128xbf16, #tpu.memory_space<vmem>>, vector<16x128xbf16>
    %c0_1 = arith.constant 0 : index
    %c0_2 = arith.constant 0 : index
    %6 = vector.load %arg8[%c0_1, %c0_2] : memref<128x32xbf16, #tpu.memory_space<vmem>>, vector<128x32xbf16>
    %cst = arith.constant dense<0.000000e+00> : vector<16x32xf32>
    %7 = tpu.matmul %5, %6, %cst {dimension_numbers = #tpu.dot_dimension_numbers<[1], [0], [0], [1], [0, 0, 1, 1], [], []>} : vector<16x128xbf16>, vector<128x32xbf16>, vector<16x32xf32> -> vector<16x32xf32>
    %8 = arith.index_cast %arg0 : i32 to index
    %9 = memref.load %arg1[%8] : memref<2xi32, #tpu.memory_space<smem>>
    %c8_i32 = arith.constant 8 : i32
    %10 = arith.muli %9, %c8_i32 : i32
    %c0_3 = arith.constant 0 : index
    %c0_4 = arith.constant 0 : index
    %c0_5 = arith.constant 0 : index
    %11 = vector.load %arg5[%c0_3, %c0_4, %c0_5] : memref<1x1x16xi32, #tpu.memory_space<vmem>>, vector<1x1x16xi32>
    %12 = vector.shape_cast %11 : vector<1x1x16xi32> to vector<1x16xi32>
    %13 = vector.broadcast %10 : i32 to vector<1x16xi32>
    %14 = arith.subi %12, %13 : vector<1x16xi32>
    %15 = tpu.iota {dimensions = array<i32: 0>} : vector<8x16xi32>
    %16 = vector.broadcast %14 : vector<1x16xi32> to vector<8x16xi32>
    %17 = arith.cmpi eq, %15, %16 : vector<8x16xi32>
    %18 = arith.extui %17 : vector<8x16xi1> to vector<8x16xi32>
    %19 = arith.sitofp %18 : vector<8x16xi32> to vector<8x16xf32>
    %20 = arith.truncf %19 : vector<8x16xf32> to vector<8x16xbf16>
    %21 = arith.truncf %7 : vector<16x32xf32> to vector<16x32xbf16>
    %cst_6 = arith.constant dense<0.000000e+00> : vector<8x32xf32>
    %22 = tpu.matmul %20, %21, %cst_6 {dimension_numbers = #tpu.dot_dimension_numbers<[1], [0], [0], [1], [0, 0, 1, 1], [], []>} : vector<8x16xbf16>, vector<16x32xbf16>, vector<8x32xf32> -> vector<8x32xf32>
    %c0_7 = arith.constant 0 : index
    %c0_8 = arith.constant 0 : index
    %23 = vector.load %arg11[%c0_7, %c0_8] : memref<8x32xf32, #tpu.memory_space<vmem>>, vector<8x32xf32>
    %c0_9 = arith.constant 0 : index
    %c0_10 = arith.constant 0 : index
    %24 = vector.load %arg7[%c0_9, %c0_10] : memref<8x1xf32, #tpu.memory_space<vmem>>, vector<8x1xf32>
    %25 = vector.broadcast %24 : vector<8x1xf32> to vector<8x32xf32>
    %26 = arith.mulf %22, %25 : vector<8x32xf32>
    %27 = arith.addf %23, %26 : vector<8x32xf32>
    %c0_11 = arith.constant 0 : index
    %c0_12 = arith.constant 0 : index
    %28 = vector.load %arg11[%c0_11, %c0_12] : memref<8x32xf32, #tpu.memory_space<vmem>>, vector<8x32xf32>
    tpu.vector_store %arg11[%c0_11, %c0_12], %27 {strides = array<i32>} : memref<8x32xf32, #tpu.memory_space<vmem>>, vector<8x32xf32>,
    return
  }
  func.func @transform_0(%arg0: i32, %arg1: memref<2xi32, #tpu.memory_space<smem>>, %arg2: memref<2xi32, #tpu.memory_space<smem>>, %arg3: memref<2xi32, #tpu.memory_space<smem>>) -> (i32, i32) {
    %0 = arith.index_cast %arg0 : i32 to index
    %1 = memref.load %arg2[%0] : memref<2xi32, #tpu.memory_space<smem>>
    %c0_i32 = arith.constant 0 : i32
    %c0_i32_0 = arith.constant 0 : i32
    return %1, %c0_i32 : i32, i32
  }
  func.func @transform_1(%arg0: i32, %arg1: memref<2xi32, #tpu.memory_space<smem>>, %arg2: memref<2xi32, #tpu.memory_space<smem>>, %arg3: memref<2xi32, #tpu.memory_space<smem>>) -> (i32, i32, i32) {
    %0 = arith.index_cast %arg0 : i32 to index
    %1 = memref.load %arg2[%0] : memref<2xi32, #tpu.memory_space<smem>>
    %c0_i32 = arith.constant 0 : i32
    %c0_i32_0 = arith.constant 0 : i32
    %c0_i32_1 = arith.constant 0 : i32
    return %1, %c0_i32, %c0_i32_0 : i32, i32, i32
  }
  func.func @transform_2(%arg0: i32, %arg1: memref<2xi32, #tpu.memory_space<smem>>, %arg2: memref<2xi32, #tpu.memory_space<smem>>, %arg3: memref<2xi32, #tpu.memory_space<smem>>) -> (i32, i32) {
    %0 = arith.index_cast %arg0 : i32 to index
    %1 = memref.load %arg1[%0] : memref<2xi32, #tpu.memory_space<smem>>
    %c0_i32 = arith.constant 0 : i32
    %c0_i32_0 = arith.constant 0 : i32
    return %1, %c0_i32 : i32, i32
  }
  func.func @transform_3(%arg0: i32, %arg1: memref<2xi32, #tpu.memory_space<smem>>, %arg2: memref<2xi32, #tpu.memory_space<smem>>, %arg3: memref<2xi32, #tpu.memory_space<smem>>) -> (i32, i32) {
    %0 = arith.index_cast %arg0 : i32 to index
    %1 = memref.load %arg1[%0] : memref<2xi32, #tpu.memory_space<smem>>
    %c0_i32 = arith.constant 0 : i32
    %c0_i32_0 = arith.constant 0 : i32
    return %1, %c0_i32 : i32, i32
  }
  func.func @transform_4(%arg0: i32, %arg1: memref<2xi32, #tpu.memory_space<smem>>, %arg2: memref<2xi32, #tpu.memory_space<smem>>, %arg3: memref<2xi32, #tpu.memory_space<smem>>) -> (i32, i32) {
    %c0_i32 = arith.constant 0 : i32
    %c0_i32_0 = arith.constant 0 : i32
    %c0_i32_1 = arith.constant 0 : i32
    return %c0_i32, %c0_i32_0 : i32, i32
  }
  func.func @transform_5(%arg0: i32, %arg1: memref<2xi32, #tpu.memory_space<smem>>, %arg2: memref<2xi32, #tpu.memory_space<smem>>, %arg3: memref<2xi32, #tpu.memory_space<smem>>) -> (i32, i32) {
    %c0_i32 = arith.constant 0 : i32
    %c0_i32_0 = arith.constant 0 : i32
    %c0_i32_1 = arith.constant 0 : i32
    return %c0_i32, %c0_i32_0 : i32, i32
  }
  func.func @transform_6(%arg0: i32, %arg1: memref<2xi32, #tpu.memory_space<smem>>, %arg2: memref<2xi32, #tpu.memory_space<smem>>, %arg3: memref<2xi32, #tpu.memory_space<smem>>) -> (i32, i32) {
    %c0_i32 = arith.constant 0 : i32
    %c0_i32_0 = arith.constant 0 : i32
    %c0_i32_1 = arith.constant 0 : i32
    return %c0_i32, %c0_i32_0 : i32, i32
  }
  func.func @transform_7(%arg0: i32, %arg1: memref<2xi32, #tpu.memory_space<smem>>, %arg2: memref<2xi32, #tpu.memory_space<smem>>, %arg3: memref<2xi32, #tpu.memory_space<smem>>) -> (i32, i32) {
    %0 = arith.index_cast %arg0 : i32 to index
    %1 = memref.load %arg1[%0] : memref<2xi32, #tpu.memory_space<smem>>
    %c0_i32 = arith.constant 0 : i32
    %c0_i32_0 = arith.constant 0 : i32
    return %1, %c0_i32 : i32, i32
  }
}

module attributes {stable_mosaic.version = 11 : i64} {
  func.func @_sorted_segment_update_kernel(%arg0: i32, %arg1: memref<2xi32, #tpu.memory_space<smem>>, %arg2: memref<2xi32, #tpu.memory_space<smem>>, %arg3: memref<2xi32, #tpu.memory_space<smem>>, %arg4: memref<16x256xbf16, #tpu.memory_space<vmem>>, %arg5: memref<1x1x16xi32, #tpu.memory_space<vmem>>, %arg6: memref<8x16xf32, #tpu.memory_space<vmem>>, %arg7: memref<8x1xf32, #tpu.memory_space<vmem>>, %arg8: memref<256x16xbf16, #tpu.memory_space<vmem>>, %arg9: memref<16x16xf32, #tpu.memory_space<vmem>>, %arg10: memref<1x16xf32, #tpu.memory_space<vmem>>, %arg11: memref<8x16xf32, #tpu.memory_space<vmem>>) attributes {dimension_semantics = [#tpu.dimension_semantics<arbitrary>], iteration_bounds = array<i64: 2>, scalar_prefetch = 3 : i64, scratch_operands = 0 : i64, tpu.core_type = #tpu.core_type<tc>, window_params = [{transform_indices = @transform_0, window_bounds = array<i64: 16, 256>}, {transform_indices = @transform_1, window_bounds = array<i64: 1, 1, 16>}, {transform_indices = @transform_2, window_bounds = array<i64: 8, 16>}, {transform_indices = @transform_3, window_bounds = array<i64: 8, 1>}, {pipeline_mode = #tpu.pipeline_mode<synchronous>, transform_indices = @transform_4, window_bounds = array<i64: 256, 16>}, {pipeline_mode = #tpu.pipeline_mode<synchronous>, transform_indices = @transform_5, window_bounds = array<i64: 16, 16>}, {pipeline_mode = #tpu.pipeline_mode<synchronous>, transform_indices = @transform_6, window_bounds = array<i64: 1, 16>}, {transform_indices = @transform_7, window_bounds = array<i64: 8, 16>}]} {
    %0 = arith.index_cast %arg0 : i32 to index
    %1 = memref.load %arg3[%0] : memref<2xi32, #tpu.memory_space<smem>>
    %c1_i32 = arith.constant 1 : i32
    %2 = arith.cmpi eq, %1, %c1_i32 : i32
    %3 = arith.extui %2 : i1 to i32
    %c0_i32 = arith.constant 0 : i32
    %4 = arith.cmpi ne, %3, %c0_i32 : i32
    scf.if %4 {
      %c0_13 = arith.constant 0 : index
      %c0_14 = arith.constant 0 : index
      %29 = vector.load %arg6[%c0_13, %c0_14] : memref<8x16xf32, #tpu.memory_space<vmem>>, vector<8x16xf32>
      %c0_15 = arith.constant 0 : index
      %c0_16 = arith.constant 0 : index
      %30 = vector.load %arg9[%c0_15, %c0_16] : memref<16x16xf32, #tpu.memory_space<vmem>>, vector<16x16xf32>
      %cst_17 = arith.constant dense<0.000000e+00> : vector<8x16xf32>
      %31 = tpu.matmul %29, %30, %cst_17 {dimension_numbers = #tpu.dot_dimension_numbers<[1], [0], [0], [1], [0, 0, 1, 1], [], []>} : vector<8x16xf32>, vector<16x16xf32>, vector<8x16xf32> -> vector<8x16xf32>
      %c0_18 = arith.constant 0 : index
      %c0_19 = arith.constant 0 : index
      %32 = vector.load %arg10[%c0_18, %c0_19] : memref<1x16xf32, #tpu.memory_space<vmem>>, vector<1x16xf32>
      %33 = vector.broadcast %32 : vector<1x16xf32> to vector<8x16xf32>
      %34 = arith.addf %31, %33 : vector<8x16xf32>
      %c0_20 = arith.constant 0 : index
      %c0_21 = arith.constant 0 : index
      %35 = vector.load %arg11[%c0_20, %c0_21] : memref<8x16xf32, #tpu.memory_space<vmem>>, vector<8x16xf32>
      tpu.vector_store %arg11[%c0_20, %c0_21], %34 {strides = array<i32>} : memref<8x16xf32, #tpu.memory_space<vmem>>, vector<8x16xf32>,
    } else {
    }
    %c0 = arith.constant 0 : index
    %c0_0 = arith.constant 0 : index
    %5 = vector.load %arg4[%c0, %c0_0] : memref<16x256xbf16, #tpu.memory_space<vmem>>, vector<16x256xbf16>
    %c0_1 = arith.constant 0 : index
    %c0_2 = arith.constant 0 : index
    %6 = vector.load %arg8[%c0_1, %c0_2] : memref<256x16xbf16, #tpu.memory_space<vmem>>, vector<256x16xbf16>
    %cst = arith.constant dense<0.000000e+00> : vector<16x16xf32>
    %7 = tpu.matmul %5, %6, %cst {dimension_numbers = #tpu.dot_dimension_numbers<[1], [0], [0], [1], [0, 0, 1, 1], [], []>} : vector<16x256xbf16>, vector<256x16xbf16>, vector<16x16xf32> -> vector<16x16xf32>
    %8 = arith.index_cast %arg0 : i32 to index
    %9 = memref.load %arg1[%8] : memref<2xi32, #tpu.memory_space<smem>>
    %c8_i32 = arith.constant 8 : i32
    %10 = arith.muli %9, %c8_i32 : i32
    %c0_3 = arith.constant 0 : index
    %c0_4 = arith.constant 0 : index
    %c0_5 = arith.constant 0 : index
    %11 = vector.load %arg5[%c0_3, %c0_4, %c0_5] : memref<1x1x16xi32, #tpu.memory_space<vmem>>, vector<1x1x16xi32>
    %12 = vector.shape_cast %11 : vector<1x1x16xi32> to vector<1x16xi32>
    %13 = vector.broadcast %10 : i32 to vector<1x16xi32>
    %14 = arith.subi %12, %13 : vector<1x16xi32>
    %15 = tpu.iota {dimensions = array<i32: 0>} : vector<8x16xi32>
    %16 = vector.broadcast %14 : vector<1x16xi32> to vector<8x16xi32>
    %17 = arith.cmpi eq, %15, %16 : vector<8x16xi32>
    %18 = arith.extui %17 : vector<8x16xi1> to vector<8x16xi32>
    %19 = arith.sitofp %18 : vector<8x16xi32> to vector<8x16xf32>
    %20 = arith.truncf %19 : vector<8x16xf32> to vector<8x16xbf16>
    %21 = arith.truncf %7 : vector<16x16xf32> to vector<16x16xbf16>
    %cst_6 = arith.constant dense<0.000000e+00> : vector<8x16xf32>
    %22 = tpu.matmul %20, %21, %cst_6 {dimension_numbers = #tpu.dot_dimension_numbers<[1], [0], [0], [1], [0, 0, 1, 1], [], []>} : vector<8x16xbf16>, vector<16x16xbf16>, vector<8x16xf32> -> vector<8x16xf32>
    %c0_7 = arith.constant 0 : index
    %c0_8 = arith.constant 0 : index
    %23 = vector.load %arg11[%c0_7, %c0_8] : memref<8x16xf32, #tpu.memory_space<vmem>>, vector<8x16xf32>
    %c0_9 = arith.constant 0 : index
    %c0_10 = arith.constant 0 : index
    %24 = vector.load %arg7[%c0_9, %c0_10] : memref<8x1xf32, #tpu.memory_space<vmem>>, vector<8x1xf32>
    %25 = vector.broadcast %24 : vector<8x1xf32> to vector<8x16xf32>
    %26 = arith.mulf %22, %25 : vector<8x16xf32>
    %27 = arith.addf %23, %26 : vector<8x16xf32>
    %c0_11 = arith.constant 0 : index
    %c0_12 = arith.constant 0 : index
    %28 = vector.load %arg11[%c0_11, %c0_12] : memref<8x16xf32, #tpu.memory_space<vmem>>, vector<8x16xf32>
    tpu.vector_store %arg11[%c0_11, %c0_12], %27 {strides = array<i32>} : memref<8x16xf32, #tpu.memory_space<vmem>>, vector<8x16xf32>,
    return
  }
  func.func @transform_0(%arg0: i32, %arg1: memref<2xi32, #tpu.memory_space<smem>>, %arg2: memref<2xi32, #tpu.memory_space<smem>>, %arg3: memref<2xi32, #tpu.memory_space<smem>>) -> (i32, i32) {
    %0 = arith.index_cast %arg0 : i32 to index
    %1 = memref.load %arg2[%0] : memref<2xi32, #tpu.memory_space<smem>>
    %c0_i32 = arith.constant 0 : i32
    %c0_i32_0 = arith.constant 0 : i32
    return %1, %c0_i32 : i32, i32
  }
  func.func @transform_1(%arg0: i32, %arg1: memref<2xi32, #tpu.memory_space<smem>>, %arg2: memref<2xi32, #tpu.memory_space<smem>>, %arg3: memref<2xi32, #tpu.memory_space<smem>>) -> (i32, i32, i32) {
    %0 = arith.index_cast %arg0 : i32 to index
    %1 = memref.load %arg2[%0] : memref<2xi32, #tpu.memory_space<smem>>
    %c0_i32 = arith.constant 0 : i32
    %c0_i32_0 = arith.constant 0 : i32
    %c0_i32_1 = arith.constant 0 : i32
    return %1, %c0_i32, %c0_i32_0 : i32, i32, i32
  }
  func.func @transform_2(%arg0: i32, %arg1: memref<2xi32, #tpu.memory_space<smem>>, %arg2: memref<2xi32, #tpu.memory_space<smem>>, %arg3: memref<2xi32, #tpu.memory_space<smem>>) -> (i32, i32) {
    %0 = arith.index_cast %arg0 : i32 to index
    %1 = memref.load %arg1[%0] : memref<2xi32, #tpu.memory_space<smem>>
    %c0_i32 = arith.constant 0 : i32
    %c0_i32_0 = arith.constant 0 : i32
    return %1, %c0_i32 : i32, i32
  }
  func.func @transform_3(%arg0: i32, %arg1: memref<2xi32, #tpu.memory_space<smem>>, %arg2: memref<2xi32, #tpu.memory_space<smem>>, %arg3: memref<2xi32, #tpu.memory_space<smem>>) -> (i32, i32) {
    %0 = arith.index_cast %arg0 : i32 to index
    %1 = memref.load %arg1[%0] : memref<2xi32, #tpu.memory_space<smem>>
    %c0_i32 = arith.constant 0 : i32
    %c0_i32_0 = arith.constant 0 : i32
    return %1, %c0_i32 : i32, i32
  }
  func.func @transform_4(%arg0: i32, %arg1: memref<2xi32, #tpu.memory_space<smem>>, %arg2: memref<2xi32, #tpu.memory_space<smem>>, %arg3: memref<2xi32, #tpu.memory_space<smem>>) -> (i32, i32) {
    %c0_i32 = arith.constant 0 : i32
    %c0_i32_0 = arith.constant 0 : i32
    %c0_i32_1 = arith.constant 0 : i32
    return %c0_i32, %c0_i32_0 : i32, i32
  }
  func.func @transform_5(%arg0: i32, %arg1: memref<2xi32, #tpu.memory_space<smem>>, %arg2: memref<2xi32, #tpu.memory_space<smem>>, %arg3: memref<2xi32, #tpu.memory_space<smem>>) -> (i32, i32) {
    %c0_i32 = arith.constant 0 : i32
    %c0_i32_0 = arith.constant 0 : i32
    %c0_i32_1 = arith.constant 0 : i32
    return %c0_i32, %c0_i32_0 : i32, i32
  }
  func.func @transform_6(%arg0: i32, %arg1: memref<2xi32, #tpu.memory_space<smem>>, %arg2: memref<2xi32, #tpu.memory_space<smem>>, %arg3: memref<2xi32, #tpu.memory_space<smem>>) -> (i32, i32) {
    %c0_i32 = arith.constant 0 : i32
    %c0_i32_0 = arith.constant 0 : i32
    %c0_i32_1 = arith.constant 0 : i32
    return %c0_i32, %c0_i32_0 : i32, i32
  }
  func.func @transform_7(%arg0: i32, %arg1: memref<2xi32, #tpu.memory_space<smem>>, %arg2: memref<2xi32, #tpu.memory_space<smem>>, %arg3: memref<2xi32, #tpu.memory_space<smem>>) -> (i32, i32) {
    %0 = arith.index_cast %arg0 : i32 to index
    %1 = memref.load %arg1[%0] : memref<2xi32, #tpu.memory_space<smem>>
    %c0_i32 = arith.constant 0 : i32
    %c0_i32_0 = arith.constant 0 : i32
    return %1, %c0_i32 : i32, i32
  }
}

</mosaic_0001>

<bundles_post_ra>
// kernel: custom-call
= control target key start
LH: loop header
LB: loop body
LE: loop exit
PB: predicated region body
PF: predicated region fallthrough
CT: control target
= control target key end

     0   :  { %s6_s0 = inlined_call_operand.vmem [shape: u32[2], index: 0, kind: output, shape index: {}]  }

// kernel: ext_gnn_forward.2
= control target key start
LH: loop header
LB: loop body
LE: loop exit
PB: predicated region body
PF: predicated region fallthrough
CT: control target
= control target key end

     0   :  { %s1068_s0 = inlined_call_operand.vmem [shape: s32[2], index: 0, kind: input, shape index: {}]   ;;  %s1069_s3 = inlined_call_operand.vmem [shape: bf16[32,128], index: 3, kind: input, shape index: {}]   ;;  %s1070_s4 = inlined_call_operand.vmem [shape: s32[2,1,16], index: 4, kind: input, shape index: {}]   ;;  %s1071_s5 = inlined_call_operand.vmem [shape: f32[8,32], index: 5, kind: input, shape index: {}]   ;;  %s1072_s6 = inlined_call_operand.vmem [shape: f32[8,1], index: 6, kind: input, shape index: {}]   ;;  %s1073_s7 = inlined_call_operand.vmem [shape: bf16[128,32], index: 7, kind: input, shape index: {}]   ;;  %s1074_s8 = inlined_call_operand.vmem [shape: f32[32,32], index: 8, kind: input, shape index: {}]   ;;  %s1075_s9 = inlined_call_operand.vmem [shape: f32[1,32], index: 9, kind: input, shape index: {}]   ;;  %s1076_s10 = inlined_call_operand.vmem [shape: f32[8,32], index: 10, kind: output, shape index: {}]   ;;  %s1077_s1 = inlined_call_operand.vmem [shape: s32[2], index: 1, kind: input, shape index: {}]   ;;  %s1078_s2 = inlined_call_operand.vmem [shape: s32[2], index: 2, kind: input, shape index: {}]  }
   0x1   :  { %s15_s15 = sshll.u32 %s1068_s0, 4  ;;  %s19_s18 = sshll.u32 %s1077_s1, 4  ;;  %s16_s15 = int_to_ptr.vmem [resolvable:$true] %s15_s15  ;;  %s20_s18 = int_to_ptr.vmem [resolvable:$true] %s19_s18 }
   0x2   :  { %s856_s19 = scalar_lea.vmem %s16_s15, 16  ;;  %p861_p1 = scmp.lt.s32.totalorder %s16_s15, %s16_s15 }
   0x3   :  { %p857_p0 = scmp.ne.s32.totalorder %s16_s15, %s856_s19  ;;  %p862_p2 = scmp.lt.s32.totalorder %s856_s19, %s856_s19 }
   0x5   :  { %p863_p3 = por %p862_p2, %p861_p1 }
   0x7   :  { %p864_p4 = pnand %p863_p3, %p857_p0 }
   0x9   :  { %867 = shalt.err (!%p864_p4)  }
   0xa   :  { %s902_s20 = smov [#allocation3]   ;;  %s868_s21 = scalar_lea.vmem %s20_s18, 16 }
   0xb   :  { %18 = dma.vmem_to_smem %s16_s15, 16, %s902_s20, [#allocation2] }
   0xc   :  { %p869_p5 = scmp.ne.s32.totalorder %s20_s18, %s868_s21  ;;  %p873_p6 = scmp.lt.s32.totalorder %s20_s18, %s20_s18 }
   0xd   :  { %p874_p7 = scmp.lt.s32.totalorder %s868_s21, %s868_s21 }
   0xf   :  { %p875_p8 = por %p874_p7, %p873_p6 }
  0x11   :  { %p876_p9 = pnand %p875_p8, %p869_p5 }
  0x13   :  { %879 = shalt.err (!%p876_p9)  }
  0x14   :  { %s903_s0 = smov [#allocation4]   ;;  %s23_s23 = sshll.u32 %s1078_s2, 4  ;;  %s24_s23 = int_to_ptr.vmem [resolvable:$true] %s23_s23 }
  0x15   :  { %22 = dma.vmem_to_smem %s20_s18, 16, %s903_s0, [#allocation2] }
  0x16   :  { %s880_s24 = scalar_lea.vmem %s24_s23, 16  ;;  %p885_p11 = scmp.lt.s32.totalorder %s24_s23, %s24_s23 }
  0x17   :  { %p881_p10 = scmp.ne.s32.totalorder %s24_s23, %s880_s24  ;;  %p886_p12 = scmp.lt.s32.totalorder %s880_s24, %s880_s24 }
  0x19   :  { %p887_p13 = por %p886_p12, %p885_p11 }
  0x1b   :  { %p888_p0 = pnand %p887_p13, %p881_p10 }
  0x1d   :  { %891 = shalt.err (!%p888_p0)  }
  0x1e   :  { %s904_s25 = smov [#allocation5]  }
  0x1f   :  { %26 = dma.vmem_to_smem %s24_s23, 16, %s904_s25, [#allocation2] }
  0x20   :  { %896 = dma.done.wait [#allocation2], 48 }
  0x21   :  { %897 = vsyncadd [#allocation2], 4294967248 }
  0x22   :  { %28 = sfence }
  0x23   :  { %s975_s26 = smov 0  }
  0x24 LB: > { %s981_s2 = sadd.s32 4294967295, %s900_s26   ;;  %p747_p1 = scmp.ge.s32.totalorder %s900_s26, 1  ;;  %s900_s26 = sphi %s975_s26, %s34_s26  }
  0x25   : > { %p299_p2 = scmp.lt.s32.totalorder %s900_s26, 3 }
  0x27   : > { %p300_p3 = pnand %p747_p1, %p299_p2 }
  0x28   : > { %s346_s27 = sld [smem:[#allocation4 + %s981_s2]] (!%p300_p3) }
  0x29   : > { %303 = sbr.rel (%p300_p3) target bundleno = 751 (0x2ef), region = 48  ;;  %s354_s28 = sld [smem:[#allocation4 + %s981_s2]] (!%p300_p3) }
  0x2a   : > { %s359_s29 = sld [smem:[#allocation3 + %s981_s2]] (!%p300_p3) }
  0x2b   : > { %s365_s30 = sld [smem:[#allocation3 + %s981_s2]] (!%p300_p3) }
  0x2c   : > { %s378_s11 = sld [smem:[#allocation5 + %s981_s2]] (!%p300_p3) }
  0x2d   : > { %s371_s12 = sld [smem:[#allocation3 + %s981_s2]] (!%p300_p3) }
  0x2e   : > { %s748_s13 = sshll.u32 (!%p300_p3), %s346_s27, 1 }
  0x2f   : > { %p355_p4 = scmp.lt.s32.totalorder (!%p300_p3), %s354_s28, 1  ;;  %p348_p5 = scmp.lt.s32.totalorder (!%p300_p3), %s748_s13, 3 }
  0x30   : > { %p360_p6 = scmp.lt.s32.totalorder %s359_s29, 0 }
  0x31   : > { %s1080_s28 = smov (!%p355_p4, %s354_s28), 1  ;;  %s1082_s13 = smov (!%p348_p5, %s748_s13), 3 }
  0x32   : > { %s357_s16 = scalar_lea.vmem %s1070_s4, %s1080_s28  ;;  %p366_p7 = scmp.lt.s32.totalorder %s365_s30, 0 }
  0x33   : > { %s749_s17 = sshll.u32 %s1082_s13, 2  ;;  %p372_p8 = scmp.lt.s32.totalorder %s371_s12, 0 }
  0x34   : > { %s1000_s20 = scalar_lea.vmem %s1069_s3, %s749_s17  ;;  %s1084_s29 = smov (!%p360_p6, %s359_s29), 0 }
  0x35   : > { %s1086_s30 = smov (!%p366_p7, %s365_s30), 0  ;;  %s750_s21 = sshll.u32 %s1084_s29, 3 }
  0x36   : > { %s363_s22 = scalar_lea.vmem %s1071_s5, %s750_s21  ;;  %s751_s23 = sshll.u32 %s1086_s30, 3 }
  0x37   : > { %s1008_s27 = scalar_lea.vmem %s1072_s6, %s751_s23  ;;  %s1088_s12 = smov (!%p372_p8, %s371_s12), 0 }
  0x38   : > { %s752_s13 = sshll.u32 %s1088_s12, 3  ;;  %p753_p9 = scmp.ne.s32.totalorder %s378_s11, 1 }
  0x39   : > { %s1013_s17 = scalar_lea.vmem %s1076_s10, %s752_s13  ;;  %v384_v0 = vld [vmem:[%s1074_s8] sm:$0xff] (!%p753_p9)  ;;  %v385_v1 = vld [vmem:[%s1074_s8 + $0x8] sm:$0xff] (!%p753_p9)  ;;  %v386_v2 = vld [vmem:[%s1074_s8 + $0x10] sm:$0xff] (!%p753_p9)  ;;  %v905_v3 = vmov (!%p753_p9), 0.0|0.0   ;;  %vm906_vm0 = vmmov (!%p753_p9), 0   ;;  %v907_v6 = vmov (!%p753_p9), 0.0  }
  0x3a   : > { %382 = sbr.rel (%p753_p9) target bundleno = 282 (0x11a), region = 52  ;;  %823 = vmatprep.subr.bf16.mxu0 (!%p753_p9), %v905_v3  ;;  %v824_v4 = vpack.c.bf16 (!%p753_p9), %v385_v1, %v384_v0  ;;  %v387_v5 = vld [vmem:[%s1074_s8 + $0x18] sm:$0xff] (!%p753_p9)  ;;  %794 = vmatprep.mubr.msk.f32.mxu0 (!%p753_p9), %vm906_vm0, %v907_v6  ;;  %v383_v8 = vld [vmem:[%s363_s22] sm:$0xff] (!%p753_p9)  ;;  %vm395_vm1 = vcmask (!%p753_p9), 261120  }
  0x3b   : > { %v827_v7 = vpack.c.bf16 (!%p753_p9), %v387_v5, %v386_v2  ;;  %v754_v9 = vld [vmem:[%s1075_s9] ss:$0 sm:$0xff] (!%p753_p9) }
  0x3c   : > { %825 = vmatpush3.bf16.msra.mxu0 (!%p753_p9), %v824_v4 }
  0x3d   : > { %826 = vmatprep.subr.bf16.mxu0 (!%p753_p9), %v905_v3 }
  0x40   : > { %828 = vmatpush3.bf16.msra.mxu0 (!%p753_p9), %v827_v7 }
  0x43   : > { %795 = vmatmul.mubr.msk.f32.vlgmr.msra.gmra.mrb[0].mxu0 %vm395_vm1, %v383_v8 }
 0x116   : > { %v465_v10 = vpop.f32.mrb[0].mxu0 }
 0x117   : > { %v466_v11 = vadd.f32 %v754_v9, %v465_v10  ;;  %v796_v12 = vpop.f32.mrb[1].mxu0 }
 0x119   : > { %469 = vst.msk [vmem:[%s1013_s17] sm:$0xff] %vm395_vm1, %v466_v11 }
 0x11a PF: > { %v847_v13 = vld [vmem:[%s1073_s7] sm:$0xff]   ;;  %v908_v14 = vmov 0.0   ;;  %v848_v15 = vld [vmem:[%s1073_s7 + $0x8] sm:$0xff]   ;;  %vm909_vm2 = vmmov 0   ;;  %v849_v16 = vld [vmem:[%s1073_s7 + $0x10] sm:$0xff]   ;;  %v910_v24 = vmov 0   ;;  %v588_v25 = vlaneseq }
 0x11b   : > { %797 = vmatprep.subr.bf16.mxu0 %v908_v14  ;;  %817 = vmatprep.subr.bf16.mxu1 %v908_v14  ;;  %v850_v17 = vld [vmem:[%s1073_s7 + $0x18] sm:$0xff]   ;;  %v851_v18 = vld [vmem:[%s1073_s7 + $0x20] sm:$0xff]   ;;  %v852_v19 = vld [vmem:[%s1073_s7 + $0x28] sm:$0xff]   ;;  %s583_s24 = sld [smem:[#allocation3 + %s981_s2]]  ;;  %vm599_vm4 = vcmask 130048   ;;  %vm652_vm5 = vcmask 261120  }
 0x11c   : > { %798 = vmatpush3.bf16.msra.mxu0 %v847_v13  ;;  %813 = vmatprep.mubr.msk.bf16.mxu0 %vm909_vm2, %v908_v14  ;;  %v853_v20 = vld [vmem:[%s1073_s7 + $0x30] sm:$0xff]   ;;  %v854_v21 = vld [vmem:[%s1073_s7 + $0x38] sm:$0xff]   ;;  %v855_v22 = vld [vmem:[%s1000_s20] sm:$0xff]   ;;  %v589_v26 = vshrl.u32 %v588_v25, 7 }
 0x11d   : > { %799 = vmatprep.subr.bf16.mxu0 %v908_v14  ;;  %819 = vmatprep.mubr.msk.bf16.mxu1 %vm909_vm2, %v908_v14  ;;  %v644_v23 = vld [vmem:[%s1008_s27] sm:$0xff] }
 0x11e   : > { %846 = vset.pattern.permute.xlu0 %v910_v24  ;;  %v585_v27 = vld [vmem:[%s357_s16] sm:$0x1]  ;;  %v592_v30 = vsub.s32 0, %v589_v26 }
 0x11f   : > { %647 = vperm.xlu0 %846, %v644_v23  }
 0x120   : > { %800 = vmatpush3.bf16.msra.mxu0 %v848_v15  ;;  %v643_v41 = vld [vmem:[%s1013_s17] sm:$0xff] }
 0x121   : > { %801 = vmatprep.subr.bf16.mxu0 %v908_v14  ;;  %s765_s25 = sshll.u32 %s583_s24, 3 }
 0x122   : > { %v586_v28 = vstv %s765_s25 }
 0x123   : > { %v587_v29 = vsub.s32 %v585_v27, %v586_v28 }
 0x124   : > { %802 = vmatpush3.bf16.msra.mxu0 %v849_v16 }
 0x125   : > { %803 = vmatprep.subr.bf16.mxu0 %v908_v14  ;;  %v593_v31 = vrot.slane %v587_v29, %v592_v30 }
 0x127   : > { %vm594_vm3 = vcmp.eq.s32.totalorder %v589_v26, %v593_v31 }
 0x128   : > { %804 = vmatpush3.bf16.msra.mxu0 %v850_v17  ;;  %v766_v34 = vsel %vm594_vm3, 1.0, %v908_v14 }
 0x129   : > { %805 = vmatprep.subr.bf16.mxu0 %v908_v14  ;;  %v597_v38 = vpack.c.bf16 %v766_v34, %v766_v34 }
 0x12c   : > { %806 = vmatpush3.bf16.msra.mxu0 %v851_v18 }
 0x12d   : > { %807 = vmatprep.subr.bf16.mxu0 %v908_v14 }
 0x130   : > { %808 = vmatpush3.bf16.msra.mxu0 %v852_v19 }
 0x131   : > { %809 = vmatprep.subr.bf16.mxu0 %v908_v14 }
 0x134   : > { %810 = vmatpush3.bf16.msra.mxu0 %v853_v20 }
 0x135   : > { %811 = vmatprep.subr.bf16.mxu0 %v908_v14 }
 0x138   : > { %812 = vmatpush3.bf16.msra.mxu0 %v854_v21 }
 0x13b   : > { %814 = vmatmul.mubr.bf16.vlgmr.msra.gmra.mrb[0].mxu0 %v855_v22 }
 0x19e   : > { %v648_v39 = vpop.permute.xlu0 %647 }
 0x20e   : > { %v576_v32 = vpop.f32.mrb[0].mxu0 }
 0x20f   : > { %v815_v33 = vpop.f32.mrb[1].mxu0 }
 0x210   : > { %v579_v35 = vpop.f32.mrb[2].mxu0 }
 0x211   : > { %v598_v36 = vpack.c.bf16 %v579_v35, %v576_v32  ;;  %v816_v37 = vpop.f32.mrb[3].mxu0 }
 0x213   : > { %818 = vmatpush3.bf16.msra.mxu1 %v598_v36 }
 0x216   : > { %820 = vmatmul.mubr.msk.bf16.vlgmr.msra.gmra.mrb[0].mxu1 %vm599_vm4, %v597_v38 }
 0x2e9   : > { %v637_v40 = vpop.f32.mrb[0].mxu1 }
 0x2ea   : > { %v650_v42 = vmul.f32 %v648_v39, %v637_v40  ;;  %v821_v43 = vpop.f32.mrb[1].mxu1 }
 0x2eb   : > { %v640_v44 = vpop.f32.mrb[2].mxu1 }
 0x2ec   : > { %v651_v45 = vadd.f32 %v650_v42, %v643_v41  ;;  %v822_v46 = vpop.f32.mrb[3].mxu1 }
 0x2ee   : > { %653 = vst.msk [vmem:[%s1013_s17] sm:$0xff] %vm652_vm5, %v651_v45 }
 0x2ef PF: > { %s34_s26 = sadd.s32 1, %s900_s26  }
 0x2f0   : > { %p31_p10 = scmp.ge.s32.totalorder %s34_s26, 4  }
 0x2f2   :  { %33 = sbr.rel (!%p31_p10) target bundleno = 36 (0x24), region = 91 }

// kernel: ext_gnn_forward.3
= control target key start
LH: loop header
LB: loop body
LE: loop exit
PB: predicated region body
PF: predicated region fallthrough
CT: control target
= control target key end

     0   :  { %s1160_s0 = inlined_call_operand.vmem [shape: s32[2], index: 0, kind: input, shape index: {}]   ;;  %s1161_s3 = inlined_call_operand.vmem [shape: bf16[32,256], index: 3, kind: input, shape index: {}]   ;;  %s1162_s4 = inlined_call_operand.vmem [shape: s32[2,1,16], index: 4, kind: input, shape index: {}]   ;;  %s1163_s5 = inlined_call_operand.vmem [shape: f32[8,16], index: 5, kind: input, shape index: {}]   ;;  %s1164_s6 = inlined_call_operand.vmem [shape: f32[8,1], index: 6, kind: input, shape index: {}]   ;;  %s1165_s7 = inlined_call_operand.vmem [shape: bf16[256,16], index: 7, kind: input, shape index: {}]   ;;  %s1166_s8 = inlined_call_operand.vmem [shape: f32[16,16], index: 8, kind: input, shape index: {}]   ;;  %s1167_s9 = inlined_call_operand.vmem [shape: f32[1,16], index: 9, kind: input, shape index: {}]   ;;  %s1168_s10 = inlined_call_operand.vmem [shape: f32[8,16], index: 10, kind: output, shape index: {}]   ;;  %s1169_s1 = inlined_call_operand.vmem [shape: s32[2], index: 1, kind: input, shape index: {}]   ;;  %s1170_s2 = inlined_call_operand.vmem [shape: s32[2], index: 2, kind: input, shape index: {}]  }
   0x1   :  { %s15_s15 = sshll.u32 %s1160_s0, 4  ;;  %s19_s18 = sshll.u32 %s1169_s1, 4  ;;  %s16_s15 = int_to_ptr.vmem [resolvable:$true] %s15_s15  ;;  %s20_s18 = int_to_ptr.vmem [resolvable:$true] %s19_s18 }
   0x2   :  { %s929_s19 = scalar_lea.vmem %s16_s15, 16  ;;  %p934_p1 = scmp.lt.s32.totalorder %s16_s15, %s16_s15 }
   0x3   :  { %p930_p0 = scmp.ne.s32.totalorder %s16_s15, %s929_s19  ;;  %p935_p2 = scmp.lt.s32.totalorder %s929_s19, %s929_s19 }
   0x5   :  { %p936_p3 = por %p935_p2, %p934_p1 }
   0x7   :  { %p937_p4 = pnand %p936_p3, %p930_p0 }
   0x9   :  { %940 = shalt.err (!%p937_p4)  }
   0xa   :  { %s975_s20 = smov [#allocation3]   ;;  %s941_s21 = scalar_lea.vmem %s20_s18, 16 }
   0xb   :  { %18 = dma.vmem_to_smem %s16_s15, 16, %s975_s20, [#allocation2] }
   0xc   :  { %p942_p5 = scmp.ne.s32.totalorder %s20_s18, %s941_s21  ;;  %p946_p6 = scmp.lt.s32.totalorder %s20_s18, %s20_s18 }
   0xd   :  { %p947_p7 = scmp.lt.s32.totalorder %s941_s21, %s941_s21 }
   0xf   :  { %p948_p8 = por %p947_p7, %p946_p6 }
  0x11   :  { %p949_p9 = pnand %p948_p8, %p942_p5 }
  0x13   :  { %952 = shalt.err (!%p949_p9)  }
  0x14   :  { %s976_s0 = smov [#allocation4]   ;;  %s23_s23 = sshll.u32 %s1170_s2, 4  ;;  %s24_s23 = int_to_ptr.vmem [resolvable:$true] %s23_s23 }
  0x15   :  { %22 = dma.vmem_to_smem %s20_s18, 16, %s976_s0, [#allocation2] }
  0x16   :  { %s953_s24 = scalar_lea.vmem %s24_s23, 16  ;;  %p958_p11 = scmp.lt.s32.totalorder %s24_s23, %s24_s23 }
  0x17   :  { %p954_p10 = scmp.ne.s32.totalorder %s24_s23, %s953_s24  ;;  %p959_p12 = scmp.lt.s32.totalorder %s953_s24, %s953_s24 }
  0x19   :  { %p960_p13 = por %p959_p12, %p958_p11 }
  0x1b   :  { %p961_p0 = pnand %p960_p13, %p954_p10 }
  0x1d   :  { %964 = shalt.err (!%p961_p0)  }
  0x1e   :  { %s977_s25 = smov [#allocation5]  }
  0x1f   :  { %26 = dma.vmem_to_smem %s24_s23, 16, %s977_s25, [#allocation2] }
  0x20   :  { %969 = dma.done.wait [#allocation2], 48 }
  0x21   :  { %970 = vsyncadd [#allocation2], 4294967248 }
  0x22   :  { %28 = sfence }
  0x23   :  { %s1048_s26 = smov 0  }
  0x24 LB: > { %s1054_s2 = sadd.s32 4294967295, %s973_s26   ;;  %p815_p1 = scmp.ge.s32.totalorder %s973_s26, 1  ;;  %s973_s26 = sphi %s1048_s26, %s34_s26  }
  0x25   : > { %p300_p2 = scmp.lt.s32.totalorder %s973_s26, 3 }
  0x27   : > { %p301_p3 = pnand %p815_p1, %p300_p2 }
  0x28   : > { %s348_s27 = sld [smem:[#allocation4 + %s1054_s2]] (!%p301_p3) }
  0x29   : > { %304 = sbr.rel (%p301_p3) target bundleno = 750 (0x2ee), region = 48  ;;  %s357_s28 = sld [smem:[#allocation4 + %s1054_s2]] (!%p301_p3) }
  0x2a   : > { %s362_s29 = sld [smem:[#allocation3 + %s1054_s2]] (!%p301_p3) }
  0x2b   : > { %s368_s30 = sld [smem:[#allocation3 + %s1054_s2]] (!%p301_p3) }
  0x2c   : > { %s381_s11 = sld [smem:[#allocation5 + %s1054_s2]] (!%p301_p3) }
  0x2d   : > { %s374_s12 = sld [smem:[#allocation3 + %s1054_s2]] (!%p301_p3) }
  0x2e   : > { %s816_s13 = sshll.u32 (!%p301_p3), %s348_s27, 1 }
  0x2f   : > { %p358_p4 = scmp.lt.s32.totalorder (!%p301_p3), %s357_s28, 1  ;;  %p350_p5 = scmp.lt.s32.totalorder (!%p301_p3), %s816_s13, 3 }
  0x30   : > { %p363_p6 = scmp.lt.s32.totalorder %s362_s29, 0 }
  0x31   : > { %s1172_s28 = smov (!%p358_p4, %s357_s28), 1  ;;  %s1174_s13 = smov (!%p350_p5, %s816_s13), 3 }
  0x32   : > { %s360_s16 = scalar_lea.vmem %s1162_s4, %s1172_s28  ;;  %p369_p7 = scmp.lt.s32.totalorder %s368_s30, 0 }
  0x33   : > { %s848_s17 = sshll.u32 %s1174_s13, 3  ;;  %p375_p8 = scmp.lt.s32.totalorder %s374_s12, 0 }
  0x34   : > { %s1073_s20 = scalar_lea.vmem %s1161_s3, %s848_s17  ;;  %s1176_s29 = smov (!%p363_p6, %s362_s29), 0 }
  0x35   : > { %s1178_s30 = smov (!%p369_p7, %s368_s30), 0  ;;  %s819_s21 = sshll.u32 %s1176_s29, 3 }
  0x36   : > { %s366_s22 = scalar_lea.vmem %s1163_s5, %s819_s21  ;;  %s820_s23 = sshll.u32 %s1178_s30, 3 }
  0x37   : > { %s1081_s27 = scalar_lea.vmem %s1164_s6, %s820_s23  ;;  %s1180_s12 = smov (!%p375_p8, %s374_s12), 0 }
  0x38   : > { %s821_s13 = sshll.u32 %s1180_s12, 3  ;;  %p822_p9 = scmp.ne.s32.totalorder %s381_s11, 1 }
  0x39   : > { %s1086_s17 = scalar_lea.vmem %s1168_s10, %s821_s13  ;;  %v387_v0 = vld [vmem:[%s1166_s8] sm:$0xff] (!%p822_p9)  ;;  %v388_v1 = vld [vmem:[%s1166_s8 + $0x8] sm:$0xff] (!%p822_p9)  ;;  %v978_v2 = vmov (!%p822_p9), 0.0|0.0   ;;  %vm979_vm0 = vmmov (!%p822_p9), 0   ;;  %v980_v4 = vmov (!%p822_p9), 0.0   ;;  %vm396_vm1 = vcmask (!%p822_p9), 130048  }
  0x3a   : > { %385 = sbr.rel (%p822_p9) target bundleno = 278 (0x116), region = 52  ;;  %889 = vmatprep.subr.bf16.mxu0 (!%p822_p9), %v978_v2  ;;  %v890_v3 = vpack.c.bf16 (!%p822_p9), %v388_v1, %v387_v0  ;;  %880 = vmatprep.mubr.msk.f32.mxu0 (!%p822_p9), %vm979_vm0, %v980_v4  ;;  %v386_v5 = vld [vmem:[%s366_s22] sm:$0xff] (!%p822_p9) }
  0x3b   : > { %v823_v6 = vld [vmem:[%s1167_s9] ss:$0 sm:$0xff] (!%p822_p9) }
  0x3c   : > { %891 = vmatpush3.bf16.msra.mxu0 (!%p822_p9), %v890_v3 }
  0x3f   : > { %881 = vmatmul.mubr.msk.f32.vlgmr.msra.gmra.mrb[0].mxu0 (!%p822_p9), %vm396_vm1, %v386_v5 }
 0x112   : > { %v466_v7 = vpop.f32.mrb[0].mxu0 }
 0x113   : > { %v467_v8 = vadd.f32 %v823_v6, %v466_v7  ;;  %v882_v9 = vpop.f32.mrb[1].mxu0 }
 0x115   : > { %470 = vst.msk [vmem:[%s1086_s17] sm:$0xff] %vm396_vm1, %v467_v8 }
 0x116 PF: > { %v910_v10 = vld [vmem:[%s1165_s7 + $0x40] sm:$0xff]   ;;  %v912_v12 = vld [vmem:[%s1165_s7 + $0x48] sm:$0xff]   ;;  %v914_v14 = vld [vmem:[%s1165_s7 + $0x50] sm:$0xff]   ;;  %v981_v28 = vmov 0.0   ;;  %vm982_vm2 = vmmov 0   ;;  %v983_v30 = vmov 0   ;;  %v657_v31 = vlaneseq }
 0x117   : > { %v911_v11 = vld [vmem:[%s1165_s7] sm:$0xff]   ;;  %852 = vmatprep.subr.bf16.mxu0 %v910_v10  ;;  %v913_v13 = vld [vmem:[%s1165_s7 + $0x8] sm:$0xff]   ;;  %v915_v15 = vld [vmem:[%s1165_s7 + $0x10] sm:$0xff]   ;;  %883 = vmatprep.subr.bf16.mxu1 %v981_v28  ;;  %s652_s21 = sld [smem:[#allocation3 + %s1054_s2]]  ;;  %vm668_vm4 = vcmask 130048  }
 0x118   : > { %853 = vmatpush3.bf16.msra.mxu0 %v911_v11  ;;  %v916_v16 = vld [vmem:[%s1165_s7 + $0x58] sm:$0xff]   ;;  %v918_v18 = vld [vmem:[%s1165_s7 + $0x60] sm:$0xff]   ;;  %v920_v20 = vld [vmem:[%s1165_s7 + $0x68] sm:$0xff]   ;;  %885 = vmatprep.mubr.msk.bf16.mxu1 %vm982_vm2, %v981_v28  ;;  %v658_v32 = vshrl.u32 %v657_v31, 7 }
 0x119   : > { %854 = vmatprep.subr.bf16.mxu0 %v912_v12  ;;  %v917_v17 = vld [vmem:[%s1165_s7 + $0x18] sm:$0xff]   ;;  %v919_v19 = vld [vmem:[%s1165_s7 + $0x20] sm:$0xff]   ;;  %v921_v22 = vld [vmem:[%s1165_s7 + $0x28] sm:$0xff]   ;;  %909 = vset.pattern.permute.xlu0 %v983_v30 }
 0x11a   : > { %v928_v21 = vld [vmem:[%s1073_s20 + $0x4] ss:$8 sps:$4 sm:$0xff]   ;;  %v922_v23 = vld [vmem:[%s1165_s7 + $0x70] sm:$0xff]   ;;  %v924_v25 = vld [vmem:[%s1165_s7 + $0x78] sm:$0xff]   ;;  %v661_v36 = vsub.s32 0, %v658_v32 }
 0x11b   : > { %643 = vmatprep.mubr.bf16.mxu0 %v928_v21  ;;  %v923_v24 = vld [vmem:[%s1165_s7 + $0x30] sm:$0xff]   ;;  %v925_v26 = vld [vmem:[%s1165_s7 + $0x38] sm:$0xff]   ;;  %v926_v27 = vld [vmem:[%s1073_s20] ss:$8 sps:$4 sm:$0xff]  }
 0x11c   : > { %855 = vmatpush3.bf16.msra.mxu0 %v913_v13  ;;  %v713_v29 = vld [vmem:[%s1081_s27] sm:$0xff] }
 0x11d   : > { %856 = vmatprep.subr.bf16.mxu0 %v914_v14  ;;  %716 = vperm.xlu0 %909, %v713_v29   ;;  %s843_s0 = sshll.u32 %s652_s21, 3  ;;  %v654_v33 = vld [vmem:[%s360_s16] sm:$0x1] }
 0x11e   : > { %v655_v34 = vstv %s843_s0  ;;  %v712_v49 = vld [vmem:[%s1086_s17] sm:$0xff] }
 0x11f   : > { %v656_v35 = vsub.s32 %v654_v33, %v655_v34 }
 0x120   : > { %857 = vmatpush3.bf16.msra.mxu0 %v915_v15 }
 0x121   : > { %858 = vmatprep.subr.bf16.mxu0 %v916_v16  ;;  %v662_v37 = vrot.slane %v656_v35, %v661_v36 }
 0x123   : > { %vm663_vm3 = vcmp.eq.s32.totalorder %v658_v32, %v662_v37 }
 0x124   : > { %859 = vmatpush3.bf16.msra.mxu0 %v917_v17  ;;  %v844_v44 = vsel %vm663_vm3, 1.0, %v981_v28 }
 0x125   : > { %860 = vmatprep.subr.bf16.mxu0 %v918_v18  ;;  %v666_v46 = vpack.c.bf16 %v844_v44, %v844_v44 }
 0x128   : > { %861 = vmatpush3.bf16.msra.mxu0 %v919_v19 }
 0x129   : > { %862 = vmatprep.subr.bf16.mxu0 %v920_v20 }
 0x12c   : > { %863 = vmatpush3.bf16.msra.mxu0 %v921_v22 }
 0x12d   : > { %864 = vmatprep.subr.bf16.mxu0 %v922_v23 }
 0x130   : > { %865 = vmatpush3.bf16.msra.mxu0 %v923_v24 }
 0x131   : > { %866 = vmatprep.subr.bf16.mxu0 %v924_v25 }
 0x134   : > { %867 = vmatpush3.bf16.msra.mxu0 %v925_v26 }
 0x137   : > { %644 = vmatmul.mubr.bf16.vlgmr.msra.gmra.mrb[0].mxu0 %v926_v27 }
 0x19c   : > { %v717_v47 = vpop.permute.xlu0 %716 }
 0x20a   : > { %v868_v38 = vpop.f32.mrb[0].mxu0 }
 0x20b   : > { %v869_v39 = vpop.f32.mrb[1].mxu0 }
 0x20c   : > { %v870_v40 = vadd.f32 %v869_v39, %v868_v38  ;;  %v871_v41 = vpop.f32.mrb[2].mxu0 }
 0x20d   : > { %v872_v42 = vpop.f32.mrb[3].mxu0 }
 0x20e   : > { %v873_v43 = vadd.f32 %v872_v42, %v871_v41 }
 0x210   : > { %v667_v45 = vpack.c.bf16 %v873_v43, %v870_v40 }
 0x212   : > { %884 = vmatpush3.bf16.msra.mxu1 %v667_v45 }
 0x215   : > { %886 = vmatmul.mubr.msk.bf16.vlgmr.msra.gmra.mrb[0].mxu1 %vm668_vm4, %v666_v46 }
 0x2e8   : > { %v706_v48 = vpop.f32.mrb[0].mxu1 }
 0x2e9   : > { %v719_v50 = vmul.f32 %v717_v47, %v706_v48  ;;  %v887_v51 = vpop.f32.mrb[1].mxu1 }
 0x2ea   : > { %v709_v52 = vpop.f32.mrb[2].mxu1 }
 0x2eb   : > { %v720_v53 = vadd.f32 %v719_v50, %v712_v49  ;;  %v888_v54 = vpop.f32.mrb[3].mxu1 }
 0x2ed   : > { %721 = vst.msk [vmem:[%s1086_s17] sm:$0xff] %vm668_vm4, %v720_v53 }
 0x2ee PF: > { %s34_s26 = sadd.s32 1, %s973_s26  }
 0x2ef   : > { %p31_p10 = scmp.ge.s32.totalorder %s34_s26, 4  }
 0x2f1   :  { %33 = sbr.rel (!%p31_p10) target bundleno = 36 (0x24), region = 91 }

</bundles_post_ra>
